<compile_context>
chip_gen: v7x
topology: tpu7x:2x2x1
jax: 0.10.0
libtpu: 0.0.40
codegen_flags: <defaults>
</compile_context>

<pallas_src>
import jax
import jax.numpy as jnp
from jax.experimental import pallas as pl
from jax.experimental.pallas import tpu as pltpu

# Same primitive set as proxylessnas-darts genotypes.PRIMITIVES
PRIMITIVES = [
    "none",
    "identity",
    "mbconv_3_3",
    "mbconv_3_5",
    "mbconv_3_7",
    "mbconv_6_3",
    "mbconv_6_5",
    "mbconv_6_7",
]


# ---------------------------------------------------------------------------
# Deterministic stand-in for the latency.csv lookup (`_predictor`).
# TODO(synk): the original looks the value up in a CSV keyed by a string like
# "14x14x80-14x14x80-expand:6-kernel:3-stride:1"; here we synthesize a
# deterministic latency from the same fields instead of reading a file.
# ---------------------------------------------------------------------------
def _predictor(op_name, c_in, c_out, size, stride):
    div = op_name.split("_")
    if div[0] in ("identity", "none"):
        return 0.0
    _, exp_rate, ksize = div
    exp_rate, ksize = int(exp_rate), int(ksize)
    out_size = size // stride
    hidden = c_in * exp_rate
    # MBConv MAC-count based synthetic latency (ms-ish scale), deterministic.
    macs = (
        c_in * hidden * size * size                      # expand 1x1
        + hidden * ksize * ksize * out_size * out_size   # depthwise kxk
        + hidden * c_out * out_size * out_size           # project 1x1
    )
    return float(macs) / 1.0e6


def _feature_map_sizes(input_size, strides):
    fms = [input_size]
    for s in strides[:-1]:
        input_size = input_size // s
        fms.append(input_size)
    return fms


def build_latency_table(channels, strides, input_size):
    """L[i, k] = latency of op k at cell i. Shape (num_cells, num_ops), f32."""
    fms = _feature_map_sizes(input_size, strides)
    num_cells = len(strides)
    table = [
        [
            _predictor(op, channels[i], channels[i + 1], fms[i], strides[i])
            for op in PRIMITIVES
        ]
        for i in range(num_cells)
    ]
    return jnp.asarray(table, dtype=jnp.float32)


# ---------------------------------------------------------------------------
# Pallas kernel: scalar = sum_n alpha_flat[n] * lat_flat[n]
#   alpha_ref: (1, C*E*K) f32 in VMEM  — alpha in its native (c, e, k) order
#   lat_ref:   (1, C*E*K) f32 in VMEM  — table pre-broadcast over edges, same order
#   out_ref:   (1, 1)     f32 in SMEM  — scalar result
# Single lane-dense VPU multiply + one reduce; no XLU sublane pass.
# ---------------------------------------------------------------------------
def _latency_loss_kernel(alpha_ref, lat_ref, out_ref):
    out_ref[0, 0] = jnp.sum(alpha_ref[...] * lat_ref[...])


def make_latency_loss(channels, steps, strides, input_size=56):
    """Mirrors LatencyLoss.__init__: bake the latency table once, return forward()."""
    lat_table = build_latency_table(channels, strides, input_size)  # (C, K) f32
    C, K = lat_table.shape
    E = steps
    N = C * E * K
    # One-time broadcast over the edge axis so the constant matches alpha's
    # NATIVE (C, E, K) flattening — the wrapper never transposes alpha.
    lat_flat = jnp.broadcast_to(lat_table[:, None, :], (C, E, K)).reshape(1, N)
    lat_flat = lat_flat.astype(jnp.float32)

    cost = pl.CostEstimate(
        flops=2 * N,                      # mul + add per element
        transcendentals=0,
        bytes_accessed=2 * 4 * N + 4,     # two f32 inputs + scalar out
    )

    @jax.jit
    def latency_loss(alpha):
        """alpha: (num_cells, num_edges, num_ops) f32 architecture weights."""
        # Pure layout-preserving reshape (no transpose, no copy kernel).
        a_flat = alpha.reshape(1, N).astype(jnp.float32)
        out = pl.pallas_call(
            _latency_loss_kernel,
            out_shape=jax.ShapeDtypeStruct((1, 1), jnp.float32),
            in_specs=[
                pl.BlockSpec(memory_space=pltpu.MemorySpace.VMEM),
                pl.BlockSpec(memory_space=pltpu.MemorySpace.VMEM),
            ],
            out_specs=pl.BlockSpec(memory_space=pltpu.MemorySpace.SMEM),
            cost_estimate=cost,
        )(a_flat, lat_flat)
        return out[0, 0]

    return latency_loss


if __name__ == "__main__":
    # Small, deterministic config (mirrors LatencyLoss(channels, steps, strides)).
    channels = [16, 24, 32, 64, 96]     # num_cells + 1 entries
    strides = [1, 2, 2, 2]              # one stride per cell
    steps = 3                           # edges per cell
    input_size = 32

    num_cells = len(strides)
    num_ops = len(PRIMITIVES)

    latency_loss = make_latency_loss(channels, steps, strides, input_size)

    key = jax.random.PRNGKey(0)
    logits = jax.random.normal(key, (num_cells, steps, num_ops), dtype=jnp.float32)
    alpha = jax.nn.softmax(logits, axis=-1)   # architecture weights

    result = jax.block_until_ready(latency_loss(alpha))

    # Pure-JAX reference of the same summation for a sanity check.
    lat_table = build_latency_table(channels, strides, input_size)
    ref = jnp.sum(alpha * lat_table[:, None, :])
    assert jnp.allclose(result, ref, rtol=1e-5, atol=1e-5), (result, ref)

    print("KERNEL_OK")
</pallas_src>

<mosaic_0001>
module attributes {stable_mosaic.version = 11 : i64} {
  func.func @_latency_loss_kernel(%arg0: memref<1x96xf32, #tpu.memory_space<vmem>>, %arg1: memref<1x96xf32, #tpu.memory_space<vmem>>, %arg2: memref<1x1xf32, #tpu.memory_space<smem>>) attributes {dimension_semantics = [], scalar_prefetch = 0 : i64, scratch_operands = 0 : i64, tpu.core_type = #tpu.core_type<tc>} {
    %c0 = arith.constant 0 : index
    %c0_0 = arith.constant 0 : index
    %0 = vector.load %arg0[%c0, %c0_0] : memref<1x96xf32, #tpu.memory_space<vmem>>, vector<1x96xf32>
    %c0_1 = arith.constant 0 : index
    %c0_2 = arith.constant 0 : index
    %1 = vector.load %arg1[%c0_1, %c0_2] : memref<1x96xf32, #tpu.memory_space<vmem>>, vector<1x96xf32>
    %2 = arith.mulf %0, %1 : vector<1x96xf32>
    %3 = vector.shape_cast %2 : vector<1x96xf32> to vector<1x1x96xf32>
    %cst = arith.constant dense<0.000000e+00> : vector<1xf32>
    %4 = vector.multi_reduction <add>, %3, %cst [1, 2] : vector<1x1x96xf32> to vector<1xf32>
    %5 = vector.shape_cast %4 : vector<1xf32> to vector<1x1x1xf32>
    %6 = vector.extract %5[0, 0, 0] : f32 from vector<1x1x1xf32>
    %c0_3 = arith.constant 0 : index
    %c0_4 = arith.constant 0 : index
    %7 = memref.load %arg2[%c0_3, %c0_4] : memref<1x1xf32, #tpu.memory_space<smem>>
    memref.store %6, %arg2[%c0_3, %c0_4] : memref<1x1xf32, #tpu.memory_space<smem>>
    return
  }
}

</mosaic_0001>

<bundles_post_ra>
// kernel: latency_loss.1
= control target key start
LH: loop header
LB: loop body
LE: loop exit
PB: predicated region body
PF: predicated region fallthrough
CT: control target
= control target key end

     0   :  { %vm15_vm0 = vcmask 778240   ;;  %s90_s0 = inlined_call_operand.vmem [shape: f32[1,96], index: 0, kind: input, shape index: {}]   ;;  %s91_s1 = inlined_call_operand.vmem [shape: f32[1,96], index: 1, kind: input, shape index: {}]   ;;  %s92_s2 = inlined_call_operand.hbm [shape: f32[1,1], index: 2, kind: output, shape index: {}]  }
   0x1   :  { %v12_v0 = vld [vmem:[%s90_s0] sm:$0x1] }
   0x2   :  { %v13_v1 = vld [vmem:[%s91_s1] sm:$0x1] }
   0x3   :  { %v14_v2 = vmul.f32 %v13_v1, %v12_v0 }
   0x4   :  { %7 = vsyncpa [#allocation3], 0  ;;  %s44_s15 = scalar_lea.hbm %s92_s2, 16 }
   0x5   :  { %v16_v3 = vsel %vm15_vm0, %v14_v2, 0.0  ;;  %p45_p0 = scmp.ne.s32.totalorder %s92_s2, %s44_s15  ;;  %p48_p1 = scmp.lt.u32.totalorder %s44_s15, %s92_s2 }
   0x6   :  { %17 = vadd.xlane.f32.xlu0 %v16_v3 }
   0x7   :  { %p50_p2 = pnand %p48_p1, %p45_p0 }
  0x93   :  { %v18_v4 = vpop.xlane.xlu0 %17 }
  0x94   :  { %v19_v5 = vrot.slane %v18_v4, 4 }
  0x96   :  { %v20_v6 = vadd.f32 %v19_v5, %v18_v4 }
  0x98   :  { %v21_v7 = vrot.slane %v20_v6, 2 }
  0x9a   :  { %v22_v8 = vadd.f32 %v21_v7, %v20_v6 }
  0x9c   :  { %v23_v9 = vrot.slane %v22_v8, 1 }
  0x9e   :  { %v24_v10 = vadd.f32 %v23_v9, %v22_v8 }
  0xa0   :  { %41 = vpush %v24_v10 }
  0xd1   :  { %s42_s13 = spop %41 }
  0xd2   :  { %27 = sst [smem:[#allocation2]] %s42_s13 }
  0xd3   :  { %53 = shalt.err (!%p50_p2)
}
  0xd4   :  { %s56_s19 = smov [#allocation2]  }
  0xd5   :  { %35 = dma.smem_to_hbm %s56_s19, 16, %s92_s2, [#allocation3]  }
  0xd6   :  { %54 = dma.done.wait [#allocation3], 16  }
  0xd7   :  { %55 = vsyncadd [#allocation3], 4294967280 }
  0xd8   :  { %39 = sfence }
  0xd9   :  { %40 = vsyncpa [#allocation3], 1 }

</bundles_post_ra>
